<compile_context>
chip_gen: v7x
topology: tpu7x:2x2x1
jax: 0.10.0
libtpu: 0.0.40
codegen_flags: <defaults>
</compile_context>

<pallas_src>
import functools

import jax
import jax.numpy as jnp
from jax import lax
from jax.experimental import pallas as pl
from jax.experimental.pallas import tpu as pltpu


def _round_up(x, m):
    return ((x + m - 1) // m) * m


def node_network_kernel(msg_ref, hid_ref, glob_ref,
                        w1a_ref, w1b_ref, w1c_ref, b1_ref,
                        w2_ref, b2_ref,
                        w3_ref, b3_ref,
                        out_ref):
    cdt = w1a_ref.dtype  # MXU operand dtype (bf16 or f32)

    # ----- layer 1: mailbox sum folded into the first matmul -----
    # sum_e(m_e) @ W1a == reshape(messages,(TM,E*D)) @ tile(W1a,(E,1))  (exact identity)
    # cat(msg_sum, h, g) @ W1 == the three split dots below (identical math).
    h = (jnp.dot(msg_ref[...].astype(cdt), w1a_ref[...],
                 preferred_element_type=jnp.float32)
         + jnp.dot(hid_ref[...].astype(cdt), w1b_ref[...],
                   preferred_element_type=jnp.float32)
         + jnp.dot(glob_ref[...].astype(cdt), w1c_ref[...],
                   preferred_element_type=jnp.float32)
         + b1_ref[...])
    h = jnp.maximum(h, 0.0).astype(cdt)

    # ----- layer 2: Linear + ReLU -----
    h = jnp.dot(h, w2_ref[...], preferred_element_type=jnp.float32) + b2_ref[...]
    h = jnp.maximum(h, 0.0).astype(cdt)

    # ----- layer 3: Linear (no activation) -----
    out = jnp.dot(h, w3_ref[...], preferred_element_type=jnp.float32) + b3_ref[...]

    # ----- row-wise L2 normalization: out / clamp(||out||, 1e-8) -----
    # == out * rsqrt(clamp(sum(out^2), 1e-16));  rsqrt runs on the (otherwise idle) EUP.
    ssq = jnp.sum(out * out, axis=1, keepdims=True)
    out_ref[...] = (out * lax.rsqrt(jnp.maximum(ssq, 1e-16))).astype(out_ref.dtype)


@functools.partial(jax.jit, static_argnames=("tile_m", "compute_dtype", "out_dtype"))
def node_network_forward(messages, hidden_rep, global_rep, params, *,
                         tile_m=512, compute_dtype=jnp.bfloat16,
                         out_dtype=jnp.float32):
    """messages: (N, E, D); hidden_rep/global_rep: (N, D). Returns (N, O) out_dtype."""
    N, E, D = messages.shape
    w1a, w1b, w1c, b1, w2, b2, w3, b3 = params
    F1 = w1a.shape[1]
    F2 = w2.shape[1]
    O = w3.shape[1]

    # Fold the mailbox sum into layer 1: free row-major reshape + E-times tiled W1a.
    msg_flat = messages.reshape(N, E * D)
    w1a_rep = jnp.tile(w1a, (E, 1))                       # (E*D, F1), tiny & resident

    cdt = jnp.dtype(compute_dtype)
    f32 = jnp.float32
    # Only the tiny resident weights are cast in the wrapper; the big activation
    # streams keep their incoming dtype (cast happens in-kernel before the dots).
    w1a_rep, w1b_c, w1c_c, w2_c, w3_c = (a.astype(cdt)
                                         for a in (w1a_rep, w1b, w1c, w2, w3))
    b1_c, b2_c, b3_c = (b.astype(f32) for b in (b1, b2, b3))

    # Tile choice: big M tiles (amortize per-step overhead), multiple of 8, but clamp
    # so the 1-D grid keeps >= ~4 steps when N allows (v7x megacore + pipeline depth).
    tile_cap = max(8, _round_up(pl.cdiv(N, 4), 8))
    tile_m = _round_up(max(8, min(tile_m, tile_cap, _round_up(N, 8))), 8)
    grid = (pl.cdiv(N, tile_m),)   # last block may be partial; Pallas masks it

    # Scoped-VMEM raise only when the (now lane-dense) double-buffered streams need it;
    # cap at 40 MiB so it stays safe on v7x's 64 MiB per-core VMEM.
    lane = lambda d: _round_up(d, 128)
    row8 = lambda r: _round_up(r, 8)
    act_isz = jnp.dtype(messages.dtype).itemsize
    hg_isz = jnp.dtype(hidden_rep.dtype).itemsize
    est = 2 * tile_m * (lane(E * D) * act_isz
                        + 2 * lane(D) * hg_isz
                        + lane(O) * jnp.dtype(out_dtype).itemsize)
    est += cdt.itemsize * (row8(E * D) * lane(F1) + 2 * row8(D) * lane(F1)
                           + row8(F1) * lane(F2) + row8(F2) * lane(O))
    est += 4 * 8 * (lane(F1) + lane(F2) + lane(O))        # f32 biases, sublane-padded
    vmem_limit = None if est < (12 << 20) else int(min(est + (8 << 20), 40 << 20))

    resident = lambda arr: pl.BlockSpec(arr.shape, lambda i: (0, 0))

    out = pl.pallas_call(
        node_network_kernel,
        out_shape=jax.ShapeDtypeStruct((N, O), out_dtype),
        grid_spec=pltpu.PrefetchScalarGridSpec(
            num_scalar_prefetch=0,
            grid=grid,
            in_specs=[
                pl.BlockSpec((tile_m, E * D), lambda i: (i, 0)),   # flattened messages
                pl.BlockSpec((tile_m, D), lambda i: (i, 0)),       # hidden rep
                pl.BlockSpec((tile_m, D), lambda i: (i, 0)),       # global rep
                resident(w1a_rep), resident(w1b_c), resident(w1c_c), resident(b1_c),
                resident(w2_c), resident(b2_c),
                resident(w3_c), resident(b3_c),
            ],
            out_specs=pl.BlockSpec((tile_m, O), lambda i: (i, 0)),
        ),
        compiler_params=pltpu.CompilerParams(
            dimension_semantics=("parallel",),      # grid >= 2 shards across v7x's 2 TCs
            vmem_limit_bytes=vmem_limit),
    )(msg_flat, hidden_rep, global_rep,
      w1a_rep, w1b_c, w1c_c, b1_c, w2_c, b2_c, w3_c, b3_c)

    return out


def reference_forward(messages, hidden_rep, global_rep, params):
    """Pure-JAX f32 reference matching the PyTorch forward."""
    w1a, w1b, w1c, b1, w2, b2, w3, b3 = params
    msg_sum = jnp.sum(messages, axis=1)
    inputs = jnp.concatenate([msg_sum, hidden_rep, global_rep], axis=1)
    w1 = jnp.concatenate([w1a, w1b, w1c], axis=0)
    h = jax.nn.relu(inputs @ w1 + b1[0])
    h = jax.nn.relu(h @ w2 + b2[0])
    out = h @ w3 + b3[0]
    norm = jnp.linalg.norm(out, axis=1, keepdims=True)
    return out / jnp.maximum(norm, 1e-8)


def init_params(key, inputsize, outputsize, layers):
    """Deterministic synthetic init of the MLP (Linear(3D,F1), Linear(F1,F2), Linear(F2,O))."""
    D = inputsize
    F1, F2 = layers
    ks = jax.random.split(key, 8)
    scale = 0.1
    w1a = scale * jax.random.normal(ks[0], (D, F1), jnp.float32)
    w1b = scale * jax.random.normal(ks[1], (D, F1), jnp.float32)
    w1c = scale * jax.random.normal(ks[2], (D, F1), jnp.float32)
    b1 = scale * jax.random.normal(ks[3], (1, F1), jnp.float32)
    w2 = scale * jax.random.normal(ks[4], (F1, F2), jnp.float32)
    b2 = scale * jax.random.normal(ks[5], (1, F2), jnp.float32)
    w3 = scale * jax.random.normal(ks[6], (F2, outputsize), jnp.float32)
    b3 = scale * jax.random.normal(ks[7], (1, outputsize), jnp.float32)
    return (w1a, w1b, w1c, b1, w2, b2, w3, b3)


if __name__ == "__main__":
    # Shapes consistent with the module's forward (node batch, mailbox, feature width).
    N = 512        # number of nodes (tile_m is auto-clamped so the parallel grid has 4 steps)
    E = 8          # mailbox messages per node
    D = 32         # inputsize (message / hidden / global feature width)
    layers = (64, 64)
    O = 32         # outputsize

    key = jax.random.PRNGKey(0)
    k_msg, k_hid, k_glob, k_par = jax.random.split(key, 4)

    messages = jax.random.normal(k_msg, (N, E, D), jnp.float32)
    hidden_rep = jax.random.normal(k_hid, (N, D), jnp.float32)
    global_rep = jax.random.normal(k_glob, (N, D), jnp.float32)
    params = init_params(k_par, D, O, layers)

    ref = reference_forward(messages, hidden_rep, global_rep, params)

    # f32 path: faithful to the module numerics, tight tolerance.
    out_f32 = node_network_forward(messages, hidden_rep, global_rep, params,
                                   compute_dtype=jnp.float32)
    out_f32 = jax.block_until_ready(out_f32)
    assert out_f32.shape == (N, O)
    assert jnp.allclose(out_f32, ref, atol=1e-4, rtol=1e-4), "f32 mismatch vs JAX reference"

    # bf16 weights + in-kernel bf16 cast of the streams (f32 MXU accumulation).
    out_bf16 = node_network_forward(messages, hidden_rep, global_rep, params,
                                    compute_dtype=jnp.bfloat16)
    out_bf16 = jax.block_until_ready(out_bf16)
    assert jnp.allclose(out_bf16, ref, atol=3e-2, rtol=3e-2), "bf16 mismatch vs JAX reference"

    # Ragged N (not a multiple of 8 or of the tile): exercises the masked partial block
    # path with no wrapper-side padding copies.
    Nr = 50
    out_r = node_network_forward(messages[:Nr], hidden_rep[:Nr], global_rep[:Nr],
                                 params, compute_dtype=jnp.float32)
    out_r = jax.block_until_ready(out_r)
    assert out_r.shape == (Nr, O)
    assert jnp.allclose(out_r, ref[:Nr], atol=1e-4, rtol=1e-4), "ragged-N mismatch"

    print("KERNEL_OK")
</pallas_src>

<mosaic_0001>
module attributes {stable_mosaic.version = 11 : i64} {
  func.func @node_network_kernel(%arg0: i32, %arg1: memref<128x256xf32, #tpu.memory_space<vmem>>, %arg2: memref<128x32xf32, #tpu.memory_space<vmem>>, %arg3: memref<128x32xf32, #tpu.memory_space<vmem>>, %arg4: memref<256x64xf32, #tpu.memory_space<vmem>>, %arg5: memref<32x64xf32, #tpu.memory_space<vmem>>, %arg6: memref<32x64xf32, #tpu.memory_space<vmem>>, %arg7: memref<1x64xf32, #tpu.memory_space<vmem>>, %arg8: memref<64x64xf32, #tpu.memory_space<vmem>>, %arg9: memref<1x64xf32, #tpu.memory_space<vmem>>, %arg10: memref<64x32xf32, #tpu.memory_space<vmem>>, %arg11: memref<1x32xf32, #tpu.memory_space<vmem>>, %arg12: memref<128x32xf32, #tpu.memory_space<vmem>>) attributes {dimension_semantics = [#tpu.dimension_semantics<parallel>], iteration_bounds = array<i64: 4>, scalar_prefetch = 0 : i64, scratch_operands = 0 : i64, tpu.core_type = #tpu.core_type<tc>, window_params = [{transform_indices = @transform_0, window_bounds = array<i64: 128, 256>}, {transform_indices = @transform_1, window_bounds = array<i64: 128, 32>}, {transform_indices = @transform_2, window_bounds = array<i64: 128, 32>}, {pipeline_mode = #tpu.pipeline_mode<synchronous>, transform_indices = @transform_3, window_bounds = array<i64: 256, 64>}, {pipeline_mode = #tpu.pipeline_mode<synchronous>, transform_indices = @transform_4, window_bounds = array<i64: 32, 64>}, {pipeline_mode = #tpu.pipeline_mode<synchronous>, transform_indices = @transform_5, window_bounds = array<i64: 32, 64>}, {pipeline_mode = #tpu.pipeline_mode<synchronous>, transform_indices = @transform_6, window_bounds = array<i64: 1, 64>}, {pipeline_mode = #tpu.pipeline_mode<synchronous>, transform_indices = @transform_7, window_bounds = array<i64: 64, 64>}, {pipeline_mode = #tpu.pipeline_mode<synchronous>, transform_indices = @transform_8, window_bounds = array<i64: 1, 64>}, {pipeline_mode = #tpu.pipeline_mode<synchronous>, transform_indices = @transform_9, window_bounds = array<i64: 64, 32>}, {pipeline_mode = #tpu.pipeline_mode<synchronous>, transform_indices = @transform_10, window_bounds = array<i64: 1, 32>}, {transform_indices = @transform_11, window_bounds = array<i64: 128, 32>}]} {
    %c0 = arith.constant 0 : index
    %c0_0 = arith.constant 0 : index
    %0 = vector.load %arg1[%c0, %c0_0] : memref<128x256xf32, #tpu.memory_space<vmem>>, vector<128x256xf32>
    %c0_1 = arith.constant 0 : index
    %c0_2 = arith.constant 0 : index
    %1 = vector.load %arg4[%c0_1, %c0_2] : memref<256x64xf32, #tpu.memory_space<vmem>>, vector<256x64xf32>
    %cst = arith.constant dense<0.000000e+00> : vector<128x64xf32>
    %2 = tpu.matmul %0, %1, %cst {dimension_numbers = #tpu.dot_dimension_numbers<[1], [0], [0], [1], [0, 0, 1, 1], [], []>} : vector<128x256xf32>, vector<256x64xf32>, vector<128x64xf32> -> vector<128x64xf32>
    %c0_3 = arith.constant 0 : index
    %c0_4 = arith.constant 0 : index
    %3 = vector.load %arg2[%c0_3, %c0_4] : memref<128x32xf32, #tpu.memory_space<vmem>>, vector<128x32xf32>
    %c0_5 = arith.constant 0 : index
    %c0_6 = arith.constant 0 : index
    %4 = vector.load %arg5[%c0_5, %c0_6] : memref<32x64xf32, #tpu.memory_space<vmem>>, vector<32x64xf32>
    %cst_7 = arith.constant dense<0.000000e+00> : vector<128x64xf32>
    %5 = tpu.matmul %3, %4, %cst_7 {dimension_numbers = #tpu.dot_dimension_numbers<[1], [0], [0], [1], [0, 0, 1, 1], [], []>} : vector<128x32xf32>, vector<32x64xf32>, vector<128x64xf32> -> vector<128x64xf32>
    %6 = arith.addf %2, %5 : vector<128x64xf32>
    %c0_8 = arith.constant 0 : index
    %c0_9 = arith.constant 0 : index
    %7 = vector.load %arg3[%c0_8, %c0_9] : memref<128x32xf32, #tpu.memory_space<vmem>>, vector<128x32xf32>
    %c0_10 = arith.constant 0 : index
    %c0_11 = arith.constant 0 : index
    %8 = vector.load %arg6[%c0_10, %c0_11] : memref<32x64xf32, #tpu.memory_space<vmem>>, vector<32x64xf32>
    %cst_12 = arith.constant dense<0.000000e+00> : vector<128x64xf32>
    %9 = tpu.matmul %7, %8, %cst_12 {dimension_numbers = #tpu.dot_dimension_numbers<[1], [0], [0], [1], [0, 0, 1, 1], [], []>} : vector<128x32xf32>, vector<32x64xf32>, vector<128x64xf32> -> vector<128x64xf32>
    %10 = arith.addf %6, %9 : vector<128x64xf32>
    %c0_13 = arith.constant 0 : index
    %c0_14 = arith.constant 0 : index
    %11 = vector.load %arg7[%c0_13, %c0_14] : memref<1x64xf32, #tpu.memory_space<vmem>>, vector<1x64xf32>
    %12 = vector.broadcast %11 : vector<1x64xf32> to vector<128x64xf32>
    %13 = arith.addf %10, %12 : vector<128x64xf32>
    %cst_15 = arith.constant 0.000000e+00 : f32
    %14 = vector.broadcast %cst_15 : f32 to vector<128x64xf32>
    %15 = arith.maximumf %13, %14 : vector<128x64xf32>
    %c0_16 = arith.constant 0 : index
    %c0_17 = arith.constant 0 : index
    %16 = vector.load %arg8[%c0_16, %c0_17] : memref<64x64xf32, #tpu.memory_space<vmem>>, vector<64x64xf32>
    %cst_18 = arith.constant dense<0.000000e+00> : vector<128x64xf32>
    %17 = tpu.matmul %15, %16, %cst_18 {dimension_numbers = #tpu.dot_dimension_numbers<[1], [0], [0], [1], [0, 0, 1, 1], [], []>} : vector<128x64xf32>, vector<64x64xf32>, vector<128x64xf32> -> vector<128x64xf32>
    %c0_19 = arith.constant 0 : index
    %c0_20 = arith.constant 0 : index
    %18 = vector.load %arg9[%c0_19, %c0_20] : memref<1x64xf32, #tpu.memory_space<vmem>>, vector<1x64xf32>
    %19 = vector.broadcast %18 : vector<1x64xf32> to vector<128x64xf32>
    %20 = arith.addf %17, %19 : vector<128x64xf32>
    %cst_21 = arith.constant 0.000000e+00 : f32
    %21 = vector.broadcast %cst_21 : f32 to vector<128x64xf32>
    %22 = arith.maximumf %20, %21 : vector<128x64xf32>
    %c0_22 = arith.constant 0 : index
    %c0_23 = arith.constant 0 : index
    %23 = vector.load %arg10[%c0_22, %c0_23] : memref<64x32xf32, #tpu.memory_space<vmem>>, vector<64x32xf32>
    %cst_24 = arith.constant dense<0.000000e+00> : vector<128x32xf32>
    %24 = tpu.matmul %22, %23, %cst_24 {dimension_numbers = #tpu.dot_dimension_numbers<[1], [0], [0], [1], [0, 0, 1, 1], [], []>} : vector<128x64xf32>, vector<64x32xf32>, vector<128x32xf32> -> vector<128x32xf32>
    %c0_25 = arith.constant 0 : index
    %c0_26 = arith.constant 0 : index
    %25 = vector.load %arg11[%c0_25, %c0_26] : memref<1x32xf32, #tpu.memory_space<vmem>>, vector<1x32xf32>
    %26 = vector.broadcast %25 : vector<1x32xf32> to vector<128x32xf32>
    %27 = arith.addf %24, %26 : vector<128x32xf32>
    %28 = arith.mulf %27, %27 : vector<128x32xf32>
    %cst_27 = arith.constant dense<0.000000e+00> : vector<128xf32>
    %29 = vector.multi_reduction <add>, %28, %cst_27 [1] : vector<128x32xf32> to vector<128xf32>
    %30 = vector.shape_cast %29 : vector<128xf32> to vector<128x1xf32>
    %cst_28 = arith.constant 1.000000e-16 : f32
    %31 = vector.broadcast %cst_28 : f32 to vector<128x1xf32>
    %32 = arith.maximumf %30, %31 : vector<128x1xf32>
    %33 = math.rsqrt %32 : vector<128x1xf32>
    %34 = vector.broadcast %33 : vector<128x1xf32> to vector<128x32xf32>
    %35 = arith.mulf %27, %34 : vector<128x32xf32>
    %c0_29 = arith.constant 0 : index
    %c0_30 = arith.constant 0 : index
    %36 = vector.load %arg12[%c0_29, %c0_30] : memref<128x32xf32, #tpu.memory_space<vmem>>, vector<128x32xf32>
    tpu.vector_store %arg12[%c0_29, %c0_30], %35 {strides = array<i32>} : memref<128x32xf32, #tpu.memory_space<vmem>>, vector<128x32xf32>,
    return
  }
  func.func @transform_0(%arg0: i32) -> (i32, i32) {
    %c0_i32 = arith.constant 0 : i32
    %c0_i32_0 = arith.constant 0 : i32
    return %arg0, %c0_i32 : i32, i32
  }
  func.func @transform_1(%arg0: i32) -> (i32, i32) {
    %c0_i32 = arith.constant 0 : i32
    %c0_i32_0 = arith.constant 0 : i32
    return %arg0, %c0_i32 : i32, i32
  }
  func.func @transform_2(%arg0: i32) -> (i32, i32) {
    %c0_i32 = arith.constant 0 : i32
    %c0_i32_0 = arith.constant 0 : i32
    return %arg0, %c0_i32 : i32, i32
  }
  func.func @transform_3(%arg0: i32) -> (i32, i32) {
    %c0_i32 = arith.constant 0 : i32
    %c0_i32_0 = arith.constant 0 : i32
    %c0_i32_1 = arith.constant 0 : i32
    return %c0_i32, %c0_i32_0 : i32, i32
  }
  func.func @transform_4(%arg0: i32) -> (i32, i32) {
    %c0_i32 = arith.constant 0 : i32
    %c0_i32_0 = arith.constant 0 : i32
    %c0_i32_1 = arith.constant 0 : i32
    return %c0_i32, %c0_i32_0 : i32, i32
  }
  func.func @transform_5(%arg0: i32) -> (i32, i32) {
    %c0_i32 = arith.constant 0 : i32
    %c0_i32_0 = arith.constant 0 : i32
    %c0_i32_1 = arith.constant 0 : i32
    return %c0_i32, %c0_i32_0 : i32, i32
  }
  func.func @transform_6(%arg0: i32) -> (i32, i32) {
    %c0_i32 = arith.constant 0 : i32
    %c0_i32_0 = arith.constant 0 : i32
    %c0_i32_1 = arith.constant 0 : i32
    return %c0_i32, %c0_i32_0 : i32, i32
  }
  func.func @transform_7(%arg0: i32) -> (i32, i32) {
    %c0_i32 = arith.constant 0 : i32
    %c0_i32_0 = arith.constant 0 : i32
    %c0_i32_1 = arith.constant 0 : i32
    return %c0_i32, %c0_i32_0 : i32, i32
  }
  func.func @transform_8(%arg0: i32) -> (i32, i32) {
    %c0_i32 = arith.constant 0 : i32
    %c0_i32_0 = arith.constant 0 : i32
    %c0_i32_1 = arith.constant 0 : i32
    return %c0_i32, %c0_i32_0 : i32, i32
  }
  func.func @transform_9(%arg0: i32) -> (i32, i32) {
    %c0_i32 = arith.constant 0 : i32
    %c0_i32_0 = arith.constant 0 : i32
    %c0_i32_1 = arith.constant 0 : i32
    return %c0_i32, %c0_i32_0 : i32, i32
  }
  func.func @transform_10(%arg0: i32) -> (i32, i32) {
    %c0_i32 = arith.constant 0 : i32
    %c0_i32_0 = arith.constant 0 : i32
    %c0_i32_1 = arith.constant 0 : i32
    return %c0_i32, %c0_i32_0 : i32, i32
  }
  func.func @transform_11(%arg0: i32) -> (i32, i32) {
    %c0_i32 = arith.constant 0 : i32
    %c0_i32_0 = arith.constant 0 : i32
    return %arg0, %c0_i32 : i32, i32
  }
}

</mosaic_0001>

<bundles_post_ra>
// kernel: node_network_forward.1
= control target key start
LH: loop header
LB: loop body
LE: loop exit
PB: predicated region body
PF: predicated region fallthrough
CT: control target
= control target key end

     0   :  { %s2401_s17 = smov 0   ;;  %s2910_s0 = inlined_call_operand.vmem [shape: f32[512,256], index: 0, kind: input, shape index: {}]   ;;  %s2911_s1 = inlined_call_operand.vmem [shape: f32[512,32], index: 1, kind: input, shape index: {}]   ;;  %s2912_s2 = inlined_call_operand.vmem [shape: f32[512,32], index: 2, kind: input, shape index: {}]   ;;  %s2913_s3 = inlined_call_operand.vmem [shape: f32[256,64], index: 3, kind: input, shape index: {}]   ;;  %s2914_s4 = inlined_call_operand.vmem [shape: f32[32,64], index: 4, kind: input, shape index: {}]   ;;  %s2915_s5 = inlined_call_operand.vmem [shape: f32[32,64], index: 5, kind: input, shape index: {}]   ;;  %s2916_s6 = inlined_call_operand.vmem [shape: f32[1,64], index: 6, kind: input, shape index: {}]   ;;  %s2917_s7 = inlined_call_operand.vmem [shape: f32[64,64], index: 7, kind: input, shape index: {}]   ;;  %s2918_s8 = inlined_call_operand.vmem [shape: f32[1,64], index: 8, kind: input, shape index: {}]   ;;  %s2919_s9 = inlined_call_operand.vmem [shape: f32[64,32], index: 9, kind: input, shape index: {}]   ;;  %s2920_s10 = inlined_call_operand.vmem [shape: f32[1,32], index: 10, kind: input, shape index: {}]   ;;  %s2921_s11 = inlined_call_operand.vmem [shape: f32[512,32], index: 11, kind: output, shape index: {}]  }
   0x1 LB: > { %s1769_s18 = sadd.s32 4294967295, %s2339_s17   ;;  %p1773_p0 = scmp.ge.s32.totalorder %s2339_s17, 1  ;;  %s2339_s17 = sphi %s2401_s17, %s21_s17  }
   0x2   : > { %p361_p1 = scmp.lt.s32.totalorder %s2339_s17, 5 }
   0x4   : > { %p362_p2 = pnand %p1773_p0, %p361_p1 }
   0x5   : > { %v517_v0 = vld [vmem:[%s2914_s4] sm:$0xff] (!%p362_p2)  ;;  %v518_v1 = vld [vmem:[%s2914_s4 + $0x8] sm:$0xff] (!%p362_p2)  ;;  %s1774_s25 = sshll.u32 (!%p362_p2), %s1769_s18, 4  ;;  %v519_v9 = vld [vmem:[%s2914_s4 + $0x10] sm:$0xff] (!%p362_p2)  ;;  %vm521_vm0 = vcmask (!%p362_p2), 261120   ;;  %vm1143_vm1 = vcmask (!%p362_p2), 523264  }
   0x6   : > { %365 = sbr.rel (%p362_p2) target bundleno = 907 (0x38b), region = 64  ;;  %v485_v2 = vld [vmem:[%s2913_s3 + $0x80] sm:$0xff] (!%p362_p2)  ;;  %v2165_v3 = vpack.c.bf16 (!%p362_p2), %v518_v1, %v517_v0  ;;  %v486_v4 = vld [vmem:[%s2913_s3 + $0x88] sm:$0xff] (!%p362_p2)  ;;  %p413_p3 = scmp.lt.s32.totalorder (!%p362_p2), %s1774_s25, 63  ;;  %v520_v10 = vld [vmem:[%s2914_s4 + $0x18] sm:$0xff] (!%p362_p2) }
   0x7   : > { %v469_v5 = vld [vmem:[%s2913_s3] sm:$0xff] (!%p362_p2)  ;;  %v470_v6 = vld [vmem:[%s2913_s3 + $0x8] sm:$0xff] (!%p362_p2)  ;;  %v2173_v7 = vpack.c.bf16 (!%p362_p2), %v486_v4, %v485_v2  ;;  %v487_v11 = vld [vmem:[%s2913_s3 + $0x90] sm:$0xff] (!%p362_p2)  ;;  %v2169_v12 = vpack.c.bf16 (!%p362_p2), %v520_v10, %v519_v9 }
   0x8   : > { %v2175_v8 = vpack.c.bf16 (!%p362_p2), %v470_v6, %v469_v5  ;;  %2166 = vmatprep.subr.bf16.mxu0 (!%p362_p2), %v2165_v3  ;;  %v488_v13 = vld [vmem:[%s2913_s3 + $0x98] sm:$0xff] (!%p362_p2)  ;;  %v471_v14 = vld [vmem:[%s2913_s3 + $0x10] sm:$0xff] (!%p362_p2)  ;;  %v489_v17 = vld [vmem:[%s2913_s3 + $0xa0] sm:$0xff] (!%p362_p2) }
   0x9   : > { %v472_v15 = vld [vmem:[%s2913_s3 + $0x18] sm:$0xff] (!%p362_p2)  ;;  %2245 = vmatprep.subr.bf16.mxu1 (!%p362_p2), %v2173_v7  ;;  %2168 = vmatpush3.bf16.msra.mxu0 (!%p362_p2), %v2165_v3  ;;  %v2177_v16 = vpack.c.bf16 (!%p362_p2), %v488_v13, %v487_v11  ;;  %v490_v18 = vld [vmem:[%s2913_s3 + $0xa8] sm:$0xff] (!%p362_p2)  ;;  %v473_v21 = vld [vmem:[%s2913_s3 + $0x20] sm:$0xff] (!%p362_p2) }
   0xa   : > { %2253 = vmatpush3.bf16.msra.mxu1 (!%p362_p2), %v2175_v8  ;;  %2170 = vmatprep.subr.bf16.mxu0 (!%p362_p2), %v2169_v12  ;;  %v2179_v19 = vpack.c.bf16 (!%p362_p2), %v472_v15, %v471_v14  ;;  %v2181_v20 = vpack.c.bf16 (!%p362_p2), %v490_v18, %v489_v17  ;;  %v474_v22 = vld [vmem:[%s2913_s3 + $0x28] sm:$0xff] (!%p362_p2)  ;;  %v491_v24 = vld [vmem:[%s2913_s3 + $0xb0] sm:$0xff] (!%p362_p2)  ;;  %v492_v25 = vld [vmem:[%s2913_s3 + $0xb8] sm:$0xff] (!%p362_p2) }
   0xb   : > { %2246 = vmatprep.subr.bf16.mxu1 (!%p362_p2), %v2177_v16  ;;  %v2183_v27 = vpack.c.bf16 (!%p362_p2), %v474_v22, %v473_v21  ;;  %v2185_v29 = vpack.c.bf16 (!%p362_p2), %v492_v25, %v491_v24  ;;  %v475_v30 = vld [vmem:[%s2913_s3 + $0x30] sm:$0xff] (!%p362_p2)  ;;  %v476_v31 = vld [vmem:[%s2913_s3 + $0x38] sm:$0xff] (!%p362_p2)  ;;  %v493_v32 = vld [vmem:[%s2913_s3 + $0xc0] sm:$0xff] (!%p362_p2) }
   0xc   : > { %v494_v33 = vld [vmem:[%s2913_s3 + $0xc8] sm:$0xff] (!%p362_p2)  ;;  %v2187_v35 = vpack.c.bf16 (!%p362_p2), %v476_v31, %v475_v30  ;;  %v477_v38 = vld [vmem:[%s2913_s3 + $0x40] sm:$0xff] (!%p362_p2)  ;;  %v495_v40 = vld [vmem:[%s2913_s3 + $0xd0] sm:$0xff] (!%p362_p2) }
   0xd   : > { %s2923_s25 = smov (!%p413_p3, %s1774_s25), 63  ;;  %2172 = vmatpush3.bf16.msra.mxu0 %v2169_v12  ;;  %v2189_v37 = vpack.c.bf16 %v494_v33, %v493_v32  ;;  %v478_v39 = vld [vmem:[%s2913_s3 + $0x48] sm:$0xff]  ;;  %v496_v41 = vld [vmem:[%s2913_s3 + $0xd8] sm:$0xff]  ;;  %v479_v47 = vld [vmem:[%s2913_s3 + $0x50] sm:$0xff] }
   0xe   : > { %s2454_s12 = sshll.u32 %s2923_s25, 3  ;;  %2254 = vmatpush3.bf16.msra.mxu1 %v2179_v19  ;;  %2174 = vmatprep.subr.bf16.mxu0 %v2173_v7  ;;  %s1852_s26 = sshll.u32 %s2923_s25, 4  ;;  %v2191_v44 = vpack.c.bf16 %v478_v39, %v477_v38  ;;  %v2193_v46 = vpack.c.bf16 %v496_v41, %v495_v40  ;;  %v480_v48 = vld [vmem:[%s2913_s3 + $0x58] sm:$0xff]  ;;  %v497_v49 = vld [vmem:[%s2913_s3 + $0xe0] sm:$0xff]  ;;  %v498_v50 = vld [vmem:[%s2913_s3 + $0xe8] sm:$0xff] }
   0xf   : > { %s2460_s15 = scalar_lea.vmem %s2911_s1, %s2454_s12  ;;  %2247 = vmatprep.subr.bf16.mxu1 %v2181_v20  ;;  %s2497_s20 = scalar_lea.vmem %s2910_s0, %s1852_s26  ;;  %v2195_v52 = vpack.c.bf16 %v480_v48, %v479_v47  ;;  %v2197_v54 = vpack.c.bf16 %v498_v50, %v497_v49  ;;  %v481_v55 = vld [vmem:[%s2913_s3 + $0x60] sm:$0xff]  ;;  %v482_v56 = vld [vmem:[%s2913_s3 + $0x68] sm:$0xff]  ;;  %v499_v57 = vld [vmem:[%s2913_s3 + $0xf0] sm:$0xff] }
  0x10   : > { %v501_v23 = vld [vmem:[%s2460_s15] sm:$0xff]  ;;  %v502_v26 = vld [vmem:[%s2460_s15 + $0x8] sm:$0xff]  ;;  %v503_v28 = vld [vmem:[%s2460_s15 + $0x10] sm:$0xff]  ;;  %v2199_v60 = vpack.c.bf16 %v482_v56, %v481_v55  ;;  %s2602_s16 = scalar_lea.vmem %s2912_s2, %s2454_s12  ;;  %s2857_s19 = scalar_lea.vmem %s2921_s11, %s2454_s12 }
  0x11   : > { %2029 = vmatprep.mubr.msk.f32.mxu0 %vm521_vm0, %v501_v23  ;;  %v504_v34 = vld [vmem:[%s2460_s15 + $0x18] sm:$0xff]  ;;  %v505_v36 = vld [vmem:[%s2460_s15 + $0x20] sm:$0xff]  ;;  %v506_v42 = vld [vmem:[%s2460_s15 + $0x28] sm:$0xff] }
  0x12   : > { %2030 = vmatmul.mubr.msk.f32.vlgmr.msra.gmra.mrb[0].mxu0 %vm521_vm0, %v502_v26  ;;  %2255 = vmatpush3.bf16.msra.mxu1 %v2183_v27  ;;  %v444_v43 = vld [vmem:[%s2497_s20 + $0x38] sm:$0xff]  ;;  %v507_v45 = vld [vmem:[%s2460_s15 + $0x30] sm:$0xff]  ;;  %v509_v53 = vld [vmem:[%s2460_s15 + $0x40] sm:$0xff] }
  0x13   : > { %2176 = vmatpush3.bf16.msra.mxu0 %v2175_v8  ;;  %2032 = vmatprep.mubr.msk.f32.mxu0 %vm521_vm0, %v503_v28  ;;  %v508_v51 = vld [vmem:[%s2460_s15 + $0x38] sm:$0xff]  ;;  %v510_v59 = vld [vmem:[%s2460_s15 + $0x48] sm:$0xff]  ;;  %v511_v61 = vld [vmem:[%s2460_s15 + $0x50] sm:$0xff] }
  0x14   : > { %2178 = vmatprep.subr.bf16.mxu0 %v2177_v16  ;;  %2248 = vmatprep.subr.bf16.mxu1 %v2185_v29  ;;  %v500_v58 = vld [vmem:[%s2913_s3 + $0xf8] sm:$0xff]  ;;  %v483_v63 = vld [vmem:[%s2913_s3 + $0x70] sm:$0xff]  ;;  %v513_v3 = vld [vmem:[%s2460_s15 + $0x60] sm:$0xff] }
  0x15   : > { %794 = vmatprep.mubr.f32.mxu1 %v444_v43  ;;  %v2201_v62 = vpack.c.bf16 %v500_v58, %v499_v57  ;;  %v484_v0 = vld [vmem:[%s2913_s3 + $0x78] sm:$0xff]  ;;  %v514_v4 = vld [vmem:[%s2460_s15 + $0x68] sm:$0xff]  ;;  %v443_v5 = vld [vmem:[%s2497_s20 + $0x30] sm:$0xff] }
  0x16   : > { %2033 = vmatmul.mubr.msk.f32.gmra.mrb[2].mxu0 %vm521_vm0, %v504_v34  ;;  %2256 = vmatpush3.bf16.msra.mxu1 %v2187_v35  ;;  %v512_v1 = vld [vmem:[%s2460_s15 + $0x58] sm:$0xff]  ;;  %v2203_v2 = vpack.c.bf16 %v484_v0, %v483_v63  ;;  %v515_v6 = vld [vmem:[%s2460_s15 + $0x70] sm:$0xff]  ;;  %v446_v7 = vld [vmem:[%s2497_s20 + $0x48] sm:$0xff] }
  0x17   : > { %2180 = vmatpush3.bf16.msra.mxu0 %v2179_v19  ;;  %2035 = vmatprep.mubr.msk.f32.mxu0 %vm521_vm0, %v505_v36  ;;  %v876_v8 = vld [vmem:[%s2915_s5] sm:$0xff]  ;;  %v877_v9 = vld [vmem:[%s2915_s5 + $0x8] sm:$0xff]  ;;  %v516_v10 = vld [vmem:[%s2460_s15 + $0x78] sm:$0xff] }
  0x18   : > { %2182 = vmatprep.subr.bf16.mxu0 %v2181_v20  ;;  %2249 = vmatprep.subr.bf16.mxu1 %v2189_v37  ;;  %v445_v11 = vld [vmem:[%s2497_s20 + $0x40] sm:$0xff]  ;;  %v438_v12 = vld [vmem:[%s2497_s20 + $0x8] sm:$0xff]  ;;  %v448_v13 = vld [vmem:[%s2497_s20 + $0x58] sm:$0xff]  ;;  %v2205_v14 = vpack.c.bf16 %v877_v9, %v876_v8 }
  0x19   : > { %v878_v15 = vld [vmem:[%s2915_s5 + $0x10] sm:$0xff]  ;;  %v879_v16 = vld [vmem:[%s2915_s5 + $0x18] sm:$0xff]  ;;  %v437_v17 = vld [vmem:[%s2497_s20] sm:$0xff] }
  0x1a   : > { %2036 = vmatmul.mubr.msk.f32.gmra.mrb[4].mxu0 %vm521_vm0, %v506_v42  ;;  %2257 = vmatpush3.bf16.msra.mxu1 %v2191_v44  ;;  %v447_v18 = vld [vmem:[%s2497_s20 + $0x50] sm:$0xff]  ;;  %v440_v19 = vld [vmem:[%s2497_s20 + $0x18] sm:$0xff]  ;;  %v450_v20 = vld [vmem:[%s2497_s20 + $0x68] sm:$0xff]  ;;  %v2209_v21 = vpack.c.bf16 %v879_v16, %v878_v15 }
  0x1b   : > { %2184 = vmatpush3.bf16.msra.mxu0 %v2183_v27  ;;  %2038 = vmatprep.mubr.msk.f32.mxu0 %vm521_vm0, %v507_v45  ;;  %v1128_v22 = vld [vmem:[%s2917_s7] sm:$0xff]  ;;  %v1129_v23 = vld [vmem:[%s2917_s7 + $0x8] sm:$0xff]  ;;  %v439_v24 = vld [vmem:[%s2497_s20 + $0x10] sm:$0xff] }
  0x1c   : > { %2186 = vmatprep.subr.bf16.mxu0 %v2185_v29  ;;  %2250 = vmatprep.subr.bf16.mxu1 %v2193_v46  ;;  %v449_v25 = vld [vmem:[%s2497_s20 + $0x60] sm:$0xff]  ;;  %v442_v26 = vld [vmem:[%s2497_s20 + $0x28] sm:$0xff]  ;;  %v452_v27 = vld [vmem:[%s2497_s20 + $0x78] sm:$0xff]  ;;  %v2213_v28 = vpack.c.bf16 %v1129_v23, %v1128_v22 }
  0x1d   : > { %v441_v29 = vld [vmem:[%s2497_s20 + $0x20] sm:$0xff]  ;;  %v451_v30 = vld [vmem:[%s2497_s20 + $0x70] sm:$0xff]  ;;  %v454_v32 = vld [vmem:[%s2497_s20 + $0x88] sm:$0xff] }
  0x1e   : > { %2039 = vmatmul.mubr.msk.f32.gmra.mrb[6].mxu0 %vm521_vm0, %v508_v51  ;;  %2258 = vmatpush3.bf16.msra.mxu1 %v2195_v52  ;;  %v860_v31 = vld [vmem:[%s2602_s16] sm:$0xff]  ;;  %v861_v33 = vld [vmem:[%s2602_s16 + $0x8] sm:$0xff]  ;;  %v456_v36 = vld [vmem:[%s2497_s20 + $0x98] sm:$0xff] }
  0x1f   : > { %2188 = vmatpush3.bf16.msra.mxu0 %v2187_v35  ;;  %2041 = vmatprep.mubr.msk.f32.mxu0 %vm521_vm0, %v509_v53  ;;  %v453_v34 = vld [vmem:[%s2497_s20 + $0x80] sm:$0xff]  ;;  %v862_v35 = vld [vmem:[%s2602_s16 + $0x10] sm:$0xff]  ;;  %v458_v40 = vld [vmem:[%s2497_s20 + $0xa8] sm:$0xff] }
  0x20   : > { %2190 = vmatprep.subr.bf16.mxu0 %v2189_v37  ;;  %2251 = vmatprep.subr.bf16.mxu1 %v2197_v54  ;;  %v863_v37 = vld [vmem:[%s2602_s16 + $0x18] sm:$0xff]  ;;  %v455_v38 = vld [vmem:[%s2497_s20 + $0x90] sm:$0xff]  ;;  %v864_v39 = vld [vmem:[%s2602_s16 + $0x20] sm:$0xff] }
  0x21   : > { %v865_v41 = vld [vmem:[%s2602_s16 + $0x28] sm:$0xff]  ;;  %v457_v42 = vld [vmem:[%s2497_s20 + $0xa0] sm:$0xff]  ;;  %v866_v43 = vld [vmem:[%s2602_s16 + $0x30] sm:$0xff] }
  0x22   : > { %2042 = vmatmul.mubr.msk.f32.gmra.mrb[8].mxu0 %vm521_vm0, %v510_v59  ;;  %2259 = vmatpush3.bf16.msra.mxu1 %v2199_v60  ;;  %v867_v45 = vld [vmem:[%s2602_s16 + $0x38] sm:$0xff]  ;;  %v868_v47 = vld [vmem:[%s2602_s16 + $0x40] sm:$0xff]  ;;  %v462_v48 = vld [vmem:[%s2497_s20 + $0xc8] sm:$0xff] }
  0x23   : > { %2192 = vmatpush3.bf16.msra.mxu0 %v2191_v44  ;;  %2044 = vmatprep.mubr.msk.f32.mxu0 %vm521_vm0, %v511_v61  ;;  %v460_v44 = vld [vmem:[%s2497_s20 + $0xb8] sm:$0xff]  ;;  %v869_v49 = vld [vmem:[%s2602_s16 + $0x48] sm:$0xff]  ;;  %v461_v50 = vld [vmem:[%s2497_s20 + $0xc0] sm:$0xff] }
  0x24   : > { %2194 = vmatprep.subr.bf16.mxu0 %v2193_v46  ;;  %2252 = vmatprep.subr.bf16.mxu1 %v2201_v62  ;;  %v459_v46 = vld [vmem:[%s2497_s20 + $0xb0] sm:$0xff]  ;;  %v871_v53 = vld [vmem:[%s2602_s16 + $0x58] sm:$0xff]  ;;  %v872_v55 = vld [vmem:[%s2602_s16 + $0x60] sm:$0xff] }
  0x25   : > { %v870_v51 = vld [vmem:[%s2602_s16 + $0x50] sm:$0xff]  ;;  %v466_v56 = vld [vmem:[%s2497_s20 + $0xe8] sm:$0xff]  ;;  %v465_v58 = vld [vmem:[%s2497_s20 + $0xe0] sm:$0xff] }
  0x26   : > { %2045 = vmatmul.mubr.msk.f32.gmra.mrb[10].mxu0 %vm521_vm0, %v512_v1  ;;  %2260 = vmatpush3.bf16.msra.mxu1 %v2203_v2  ;;  %v873_v57 = vld [vmem:[%s2602_s16 + $0x68] sm:$0xff]  ;;  %v874_v59 = vld [vmem:[%s2602_s16 + $0x70] sm:$0xff]  ;;  %v875_v61 = vld [vmem:[%s2602_s16 + $0x78] sm:$0xff] }
  0x27   : > { %2196 = vmatpush3.bf16.msra.mxu0 %v2195_v52  ;;  %2047 = vmatprep.mubr.msk.f32.mxu0 %vm521_vm0, %v513_v3  ;;  %v464_v52 = vld [vmem:[%s2497_s20 + $0xd8] sm:$0xff]  ;;  %v1130_v63 = vld [vmem:[%s2917_s7 + $0x10] sm:$0xff]  ;;  %v1133_v3 = vld [vmem:[%s2917_s7 + $0x28] sm:$0xff] }
  0x28   : > { %2198 = vmatprep.subr.bf16.mxu0 %v2197_v54  ;;  %v463_v54 = vld [vmem:[%s2497_s20 + $0xd0] sm:$0xff]  ;;  %v1131_v0 = vld [vmem:[%s2917_s7 + $0x18] sm:$0xff]  ;;  %v1353_v8 = vld [vmem:[%s2919_s9] sm:$0xff] }
  0x29   : > { %795 = vmatmul.mubr.f32.vlgmr.msra.gmra.mrb[0].mxu1 %v443_v5  ;;  %v2217_v1 = vpack.c.bf16 %v1131_v0, %v1130_v63  ;;  %v1134_v5 = vld [vmem:[%s2917_s7 + $0x30] sm:$0xff]  ;;  %v1354_v9 = vld [vmem:[%s2919_s9 + $0x8] sm:$0xff] }
  0x2a   : > { %2048 = vmatmul.mubr.msk.f32.gmra.mrb[12].mxu0 %vm521_vm0, %v514_v4  ;;  %799 = vmatprep.mubr.f32.mxu1 %v446_v7  ;;  %v1358_v15 = vld [vmem:[%s2919_s9 + $0x28] sm:$0xff] }
  0x2b   : > { %2200 = vmatpush3.bf16.msra.mxu0 %v2199_v60  ;;  %2050 = vmatprep.mubr.msk.f32.mxu0 %vm521_vm0, %v515_v6  ;;  %v468_v60 = vld [vmem:[%s2497_s20 + $0xf8] sm:$0xff] }
  0x2c   : > { %2202 = vmatprep.subr.bf16.mxu0 %v2201_v62  ;;  %v467_v62 = vld [vmem:[%s2497_s20 + $0xf0] sm:$0xff]  ;;  %v1135_v6 = vld [vmem:[%s2917_s7 + $0x38] sm:$0xff] }
  0x2d   : > { %800 = vmatmul.mubr.f32.gmra.mrb[2].mxu1 %v445_v11  ;;  %v2225_v7 = vpack.c.bf16 %v1135_v6, %v1134_v5  ;;  %v2229_v11 = vpack.c.bf16 %v1354_v9, %v1353_v8 }
  0x2e   : > { %2051 = vmatmul.mubr.msk.f32.gmra.mrb[14].mxu0 %vm521_vm0, %v516_v10  ;;  %804 = vmatprep.mubr.f32.mxu1 %v448_v13  ;;  %v1355_v10 = vld [vmem:[%s2919_s9 + $0x10] sm:$0xff] }
  0x2f   : > { %2204 = vmatpush3.bf16.msra.mxu0 %v2203_v2  ;;  %779 = vmatprep.mubr.f32.mxu0 %v438_v12  ;;  %v1132_v2 = vld [vmem:[%s2917_s7 + $0x20] sm:$0xff]  ;;  %v1356_v12 = vld [vmem:[%s2919_s9 + $0x18] sm:$0xff] }
  0x30   : > { %2206 = vmatprep.subr.bf16.mxu0 %v2205_v14  ;;  %v2221_v4 = vpack.c.bf16 %v1133_v3, %v1132_v2  ;;  %v2233_v13 = vpack.c.bf16 %v1356_v12, %v1355_v10  ;;  %2230 = vmatprep.subr.bf16.mxu1 %v2229_v11 }
  0x31   : > { %805 = vmatmul.mubr.f32.gmra.mrb[4].mxu1 %v447_v18  ;;  %v1360_v18 = vld [vmem:[%s2919_s9 + $0x38] sm:$0xff] }
  0x32   : > { %780 = vmatmul.mubr.f32.vlgmr.msra.gmra.mrb[16].mxu0 %v437_v17  ;;  %809 = vmatprep.mubr.f32.mxu1 %v450_v20  ;;  %v1359_v17 = vld [vmem:[%s2919_s9 + $0x30] sm:$0xff] }
  0x33   : > { %2208 = vmatpush3.bf16.msra.mxu0 %v2205_v14  ;;  %784 = vmatprep.mubr.f32.mxu0 %v440_v19  ;;  %v1357_v14 = vld [vmem:[%s2919_s9 + $0x20] sm:$0xff]  ;;  %v2241_v19 = vpack.c.bf16 %v1360_v18, %v1359_v17 }
  0x34   : > { %2210 = vmatprep.subr.bf16.mxu0 %v2209_v21  ;;  %2232 = vmatpush3.bf16.msra.mxu1 %v2229_v11  ;;  %v2237_v16 = vpack.c.bf16 %v1358_v15, %v1357_v14 }
  0x35   : > { %810 = vmatmul.mubr.f32.gmra.mrb[6].mxu1 %v449_v25  ;;  %2234 = vmatprep.subr.bf16.mxu1 %v2233_v13 }
  0x36   : > { %785 = vmatmul.mubr.f32.gmra.mrb[18].mxu0 %v439_v24  ;;  %814 = vmatprep.mubr.f32.mxu1 %v452_v27 }
  0x37   : > { %789 = vmatprep.mubr.f32.mxu0 %v442_v26  ;;  %2212 = vmatpush3.bf16.msra.mxu0 %v2209_v21 }
  0x38   : > { %2214 = vmatprep.subr.bf16.mxu0 %v2213_v28  ;;  %2236 = vmatpush3.bf16.msra.mxu1 %v2233_v13 }
  0x39   : > { %815 = vmatmul.mubr.f32.gmra.mrb[8].mxu1 %v451_v30  ;;  %2238 = vmatprep.subr.bf16.mxu1 %v2237_v16 }
  0x3a   : > { %790 = vmatmul.mubr.f32.gmra.mrb[20].mxu0 %v441_v29  ;;  %819 = vmatprep.mubr.f32.mxu1 %v454_v32 }
  0x3b   : > { %2061 = vmatprep.mubr.msk.f32.mxu0 %vm521_vm0, %v860_v31 }
  0x3c   : > { %2240 = vmatpush3.bf16.msra.mxu1 %v2237_v16 }
  0x3d   : > { %820 = vmatmul.mubr.f32.gmra.mrb[10].mxu1 %v453_v34  ;;  %2242 = vmatprep.subr.bf16.mxu1 %v2241_v19 }
  0x3e   : > { %2062 = vmatmul.mubr.msk.f32.vlgmr.msra.gmra.mrb[0].mxu0 %vm521_vm0, %v861_v33  ;;  %824 = vmatprep.mubr.f32.mxu1 %v456_v36 }
  0x3f   : > { %2064 = vmatprep.mubr.msk.f32.mxu0 %vm521_vm0, %v862_v35  ;;  %2216 = vmatpush3.bf16.msra.mxu0 %v2213_v28 }
  0x40   : > { %2218 = vmatprep.subr.bf16.mxu0 %v2217_v1  ;;  %2244 = vmatpush3.bf16.msra.mxu1 %v2241_v19 }
  0x41   : > { %825 = vmatmul.mubr.f32.gmra.mrb[12].mxu1 %v455_v38 }
  0x42   : > { %2065 = vmatmul.mubr.msk.f32.gmra.mrb[2].mxu0 %vm521_vm0, %v863_v37  ;;  %829 = vmatprep.mubr.f32.mxu1 %v458_v40 }
  0x43   : > { %2067 = vmatprep.mubr.msk.f32.mxu0 %vm521_vm0, %v864_v39  ;;  %2220 = vmatpush3.bf16.msra.mxu0 %v2217_v1 }
  0x44   : > { %2222 = vmatprep.subr.bf16.mxu0 %v2221_v4 }
  0x45   : > { %830 = vmatmul.mubr.f32.gmra.mrb[14].mxu1 %v457_v42 }
  0x46   : > { %2068 = vmatmul.mubr.msk.f32.gmra.mrb[4].mxu0 %vm521_vm0, %v865_v41  ;;  %834 = vmatprep.mubr.f32.mxu1 %v460_v44 }
  0x47   : > { %2070 = vmatprep.mubr.msk.f32.mxu0 %vm521_vm0, %v866_v43  ;;  %2224 = vmatpush3.bf16.msra.mxu0 %v2221_v4 }
  0x48   : > { %2226 = vmatprep.subr.bf16.mxu0 %v2225_v7 }
  0x49   : > { %835 = vmatmul.mubr.f32.gmra.mrb[16].mxu1 %v459_v46 }
  0x4a   : > { %2071 = vmatmul.mubr.msk.f32.gmra.mrb[6].mxu0 %vm521_vm0, %v867_v45  ;;  %839 = vmatprep.mubr.f32.mxu1 %v462_v48  ;;  %v2699_v45 = vld [vmem:[%s2916_s6] ss:$0 sm:$0xff] }
  0x4b   : > { %2073 = vmatprep.mubr.msk.f32.mxu0 %vm521_vm0, %v868_v47  ;;  %2228 = vmatpush3.bf16.msra.mxu0 %v2225_v7 }
  0x4d   : > { %840 = vmatmul.mubr.f32.gmra.mrb[18].mxu1 %v461_v50 }
  0x4e   : > { %2074 = vmatmul.mubr.msk.f32.gmra.mrb[8].mxu0 %vm521_vm0, %v869_v49  ;;  %844 = vmatprep.mubr.f32.mxu1 %v464_v52 }
  0x4f   : > { %2076 = vmatprep.mubr.msk.f32.mxu0 %vm521_vm0, %v870_v51 }
  0x51   : > { %845 = vmatmul.mubr.f32.gmra.mrb[20].mxu1 %v463_v54 }
  0x52   : > { %2077 = vmatmul.mubr.msk.f32.gmra.mrb[10].mxu0 %vm521_vm0, %v871_v53  ;;  %849 = vmatprep.mubr.f32.mxu1 %v466_v56 }
  0x53   : > { %2079 = vmatprep.mubr.msk.f32.mxu0 %vm521_vm0, %v872_v55 }
  0x55   : > { %850 = vmatmul.mubr.f32.gmra.mrb[22].mxu1 %v465_v58 }
  0x56   : > { %2080 = vmatmul.mubr.msk.f32.gmra.mrb[12].mxu0 %vm521_vm0, %v873_v57  ;;  %854 = vmatprep.mubr.f32.mxu1 %v468_v60 }
  0x57   : > { %2082 = vmatprep.mubr.msk.f32.mxu0 %vm521_vm0, %v874_v59 }
  0x59   : > { %855 = vmatmul.mubr.f32.gmra.mrb[24].mxu1 %v467_v62 }
  0x5a   : > { %2083 = vmatmul.mubr.msk.f32.gmra.mrb[14].mxu0 %vm521_vm0, %v875_v61 }
  0xfc   : > { %v1914_v20 = vpop.f32.mrb[0].mxu1 }
  0xfd   : > { %v1915_v21 = vpop.f32.mrb[1].mxu1 }
  0xfe   : > { %v1916_v22 = vadd.f32 %v1915_v21, %v1914_v20 }
 0x100   : > { %v1917_v23 = vpop.f32.mrb[2].mxu1 }
 0x101   : > { %v1918_v24 = vpop.f32.mrb[3].mxu1 }
 0x102   : > { %v1919_v25 = vadd.f32 %v1918_v24, %v1917_v23 }
 0x104   : > { %v1920_v28 = vpop.f32.mrb[4].mxu1 }
 0x105   : > { %v1905_v26 = vpop.f32.mrb[16].mxu0  ;;  %v1921_v30 = vpop.f32.mrb[5].mxu1 }
 0x106   : > { %v1906_v27 = vpop.f32.mrb[17].mxu0  ;;  %v1922_v31 = vadd.f32 %v1921_v30, %v1920_v28 }
 0x107   : > { %v1907_v29 = vadd.f32 %v1906_v27, %v1905_v26 }
 0x108   : > { %v1923_v34 = vpop.f32.mrb[6].mxu1 }
 0x109   : > { %v1908_v32 = vpop.f32.mrb[18].mxu0  ;;  %v1924_v36 = vpop.f32.mrb[7].mxu1 }
 0x10a   : > { %v1909_v33 = vpop.f32.mrb[19].mxu0  ;;  %v1925_v37 = vadd.f32 %v1924_v36, %v1923_v34 }
 0x10b   : > { %v1910_v35 = vadd.f32 %v1909_v33, %v1908_v32 }
 0x10c   : > { %v1926_v40 = vpop.f32.mrb[8].mxu1 }
 0x10d   : > { %v1911_v38 = vpop.f32.mrb[20].mxu0  ;;  %v1927_v42 = vpop.f32.mrb[9].mxu1 }
 0x10e   : > { %v1912_v39 = vpop.f32.mrb[21].mxu0  ;;  %v1928_v43 = vadd.f32 %v1927_v42, %v1926_v40 }
 0x10f   : > { %v1913_v41 = vadd.f32 %v1912_v39, %v1911_v38 }
 0x110   : > { %v1929_v48 = vpop.f32.mrb[10].mxu1 }
 0x111   : > { %v2063_v44 = vpop.f32.mrb[0].mxu0  ;;  %v1930_v50 = vpop.f32.mrb[11].mxu1 }
 0x112   : > { %v2261_v46 = vadd.f32 %v2063_v44, %v1910_v35  ;;  %v994_v47 = vpop.f32.mrb[1].mxu0  ;;  %v1931_v52 = vadd.f32 %v1930_v50, %v1929_v48 }
 0x113   : > { %v2262_v49 = vadd.f32 %v1907_v29, %v994_v47 }
 0x114   : > { %v1097_v51 = vadd.f32 %v2261_v46, %v2699_v45  ;;  %v1932_v57 = vpop.f32.mrb[12].mxu1 }
 0x115   : > { %v1096_v53 = vadd.f32 %v2262_v49, %v2699_v45  ;;  %v2066_v54 = vpop.f32.mrb[2].mxu0  ;;  %v1933_v60 = vpop.f32.mrb[13].mxu1 }
 0x116   : > { %v2263_v55 = vadd.f32 %v2066_v54, %v1916_v22  ;;  %v1004_v56 = vpop.f32.mrb[3].mxu0  ;;  %v1113_v61 = vmax.f32 %v1097_v51, 0.0  ;;  %v1934_v63 = vadd.f32 %v1933_v60, %v1932_v57 }
 0x117   : > { %v1112_v58 = vmax.f32 %v1096_v53, 0.0  ;;  %v2264_v59 = vadd.f32 %v1913_v41, %v1004_v56 }
 0x118   : > { %v1099_v62 = vadd.f32 %v2263_v55, %v2699_v45  ;;  %v1935_v4 = vpop.f32.mrb[14].mxu1 }
 0x119   : > { %v1098_v0 = vadd.f32 %v2264_v59, %v2699_v45  ;;  %v2069_v1 = vpop.f32.mrb[4].mxu0  ;;  %2101 = vmatprep.mubr.msk.f32.mxu0 %vm1143_vm1, %v1112_v58  ;;  %v1936_v7 = vpop.f32.mrb[15].mxu1 }
 0x11a   : > { %v2265_v2 = vadd.f32 %v2069_v1, %v1922_v31  ;;  %v1014_v3 = vpop.f32.mrb[5].mxu0  ;;  %2102 = vmatmul.mubr.msk.f32.vlgmr.msra.gmra.mrb[22].mxu0 %vm1143_vm1, %v1113_v61  ;;  %v1115_v8 = vmax.f32 %v1099_v62, 0.0  ;;  %v1937_v10 = vadd.f32 %v1936_v7, %v1935_v4 }
 0x11b   : > { %v1114_v5 = vmax.f32 %v1098_v0, 0.0  ;;  %v2266_v6 = vadd.f32 %v1919_v25, %v1014_v3 }
 0x11c   : > { %v1101_v9 = vadd.f32 %v2265_v2, %v2699_v45  ;;  %v1938_v15 = vpop.f32.mrb[16].mxu1 }
 0x11d   : > { %v1100_v11 = vadd.f32 %v2266_v6, %v2699_v45  ;;  %v2072_v12 = vpop.f32.mrb[6].mxu0  ;;  %2104 = vmatprep.mubr.msk.f32.mxu0 %vm1143_vm1, %v1114_v5  ;;  %v1939_v18 = vpop.f32.mrb[17].mxu1  ;;  %v1816_v6 = vld [vmem:[%s2918_s8] ss:$0 sm:$0xff] }
 0x11e   : > { %v2267_v13 = vadd.f32 %v2072_v12, %v1928_v43  ;;  %v1024_v14 = vpop.f32.mrb[7].mxu0  ;;  %2105 = vmatmul.mubr.msk.f32.gmra.mrb[24].mxu0 %vm1143_vm1, %v1115_v8  ;;  %v1117_v19 = vmax.f32 %v1101_v9, 0.0  ;;  %v1940_v21 = vadd.f32 %v1939_v18, %v1938_v15 }
 0x11f   : > { %v1116_v16 = vmax.f32 %v1100_v11, 0.0  ;;  %v2268_v17 = vadd.f32 %v1925_v37, %v1024_v14 }
 0x120   : > { %v1103_v20 = vadd.f32 %v2267_v13, %v2699_v45  ;;  %v1941_v26 = vpop.f32.mrb[18].mxu1 }
 0x121   : > { %v1102_v22 = vadd.f32 %v2268_v17, %v2699_v45  ;;  %v2075_v23 = vpop.f32.mrb[8].mxu0  ;;  %2107 = vmatprep.mubr.msk.f32.mxu0 %vm1143_vm1, %v1116_v16  ;;  %v1942_v29 = vpop.f32.mrb[19].mxu1 }
 0x122   : > { %v2269_v24 = vadd.f32 %v2075_v23, %v1934_v63  ;;  %v1034_v25 = vpop.f32.mrb[9].mxu0  ;;  %2108 = vmatmul.mubr.msk.f32.gmra.mrb[26].mxu0 %vm1143_vm1, %v1117_v19  ;;  %v1119_v30 = vmax.f32 %v1103_v20, 0.0  ;;  %v1943_v32 = vadd.f32 %v1942_v29, %v1941_v26 }
 0x123   : > { %v1118_v27 = vmax.f32 %v1102_v22, 0.0  ;;  %v2270_v28 = vadd.f32 %v1931_v52, %v1034_v25 }
 0x124   : > { %v1105_v31 = vadd.f32 %v2269_v24, %v2699_v45  ;;  %v1944_v36 = vpop.f32.mrb[20].mxu1 }
 0x125   : > { %v1104_v33 = vadd.f32 %v2270_v28, %v2699_v45  ;;  %v2078_v34 = vpop.f32.mrb[10].mxu0  ;;  %2110 = vmatprep.mubr.msk.f32.mxu0 %vm1143_vm1, %v1118_v27  ;;  %v1945_v40 = vpop.f32.mrb[21].mxu1 }
 0x126   : > { %v2271_v35 = vadd.f32 %v2078_v34, %v1940_v21  ;;  %v1044_v37 = vpop.f32.mrb[11].mxu0  ;;  %2111 = vmatmul.mubr.msk.f32.gmra.mrb[28].mxu0 %vm1143_vm1, %v1119_v30  ;;  %v1121_v41 = vmax.f32 %v1105_v31, 0.0  ;;  %v1946_v43 = vadd.f32 %v1945_v40, %v1944_v36 }
 0x127   : > { %v1120_v38 = vmax.f32 %v1104_v33, 0.0  ;;  %v2272_v39 = vadd.f32 %v1937_v10, %v1044_v37 }
 0x128   : > { %v1107_v42 = vadd.f32 %v2271_v35, %v2699_v45  ;;  %v1947_v49 = vpop.f32.mrb[22].mxu1 }
 0x129   : > { %v1106_v44 = vadd.f32 %v2272_v39, %v2699_v45  ;;  %v2081_v46 = vpop.f32.mrb[12].mxu0  ;;  %2113 = vmatprep.mubr.msk.f32.mxu0 %vm1143_vm1, %v1120_v38  ;;  %v1948_v52 = vpop.f32.mrb[23].mxu1 }
 0x12a   : > { %v2273_v47 = vadd.f32 %v2081_v46, %v1946_v43  ;;  %v1054_v48 = vpop.f32.mrb[13].mxu0  ;;  %2114 = vmatmul.mubr.msk.f32.gmra.mrb[30].mxu0 %vm1143_vm1, %v1121_v41  ;;  %v1123_v53 = vmax.f32 %v1107_v42, 0.0  ;;  %v1949_v55 = vadd.f32 %v1948_v52, %v1947_v49 }
 0x12b   : > { %v1122_v50 = vmax.f32 %v1106_v44, 0.0  ;;  %v2274_v51 = vadd.f32 %v1943_v32, %v1054_v48 }
 0x12c   : > { %v1109_v54 = vadd.f32 %v2273_v47, %v2699_v45  ;;  %v1950_v58 = vpop.f32.mrb[24].mxu1 }
 0x12d   : > { %v1108_v56 = vadd.f32 %v2274_v51, %v2699_v45  ;;  %v2084_v57 = vpop.f32.mrb[14].mxu0  ;;  %2116 = vmatprep.mubr.msk.f32.mxu0 %vm1143_vm1, %v1122_v50  ;;  %v1951_v61 = vpop.f32.mrb[25].mxu1 }
 0x12e   : > { %v1064_v59 = vpop.f32.mrb[15].mxu0  ;;  %2117 = vmatmul.mubr.msk.f32.gmra.mrb[32].mxu0 %vm1143_vm1, %v1123_v53  ;;  %v1125_v63 = vmax.f32 %v1109_v54, 0.0  ;;  %v1952_v0 = vadd.f32 %v1951_v61, %v1950_v58 }
 0x12f   : > { %v1124_v60 = vmax.f32 %v1108_v56, 0.0  ;;  %v2276_v62 = vadd.f32 %v1949_v55, %v1064_v59  ;;  %v2755_v55 = vld [vmem:[%s2920_s10] ss:$0 sm:$0xff] }
 0x130   : > { %v2275_v2 = vadd.f32 %v2084_v57, %v1952_v0 }
 0x131   : > { %v1110_v1 = vadd.f32 %v2276_v62, %v2699_v45  ;;  %2119 = vmatprep.mubr.msk.f32.mxu0 %vm1143_vm1, %v1124_v60 }
 0x132   : > { %2120 = vmatmul.mubr.msk.f32.gmra.mrb[34].mxu0 %vm1143_vm1, %v1125_v63  ;;  %v1111_v4 = vadd.f32 %v2275_v2, %v2699_v45 }
 0x133   : > { %v1126_v3 = vmax.f32 %v1110_v1, 0.0 }
 0x134   : > { %v1127_v5 = vmax.f32 %v1111_v4, 0.0 }
 0x135   : > { %2122 = vmatprep.mubr.msk.f32.mxu0 %vm1143_vm1, %v1126_v3 }
 0x136   : > { %2123 = vmatmul.mubr.msk.f32.gmra.mrb[36].mxu0 %vm1143_vm1, %v1127_v5 }
 0x1ed   : > { %v2103_v7 = vpop.f32.mrb[22].mxu0 }
 0x1ee   : > { %v1264_v8 = vadd.f32 %v2103_v7, %v1816_v6  ;;  %v1258_v9 = vpop.f32.mrb[23].mxu0 }
 0x1ef   : > { %v1259_v10 = vadd.f32 %v1816_v6, %v1258_v9 }
 0x1f0   : > { %v1338_v13 = vmax.f32 %v1264_v8, 0.0 }
 0x1f1   : > { %v1337_v11 = vmax.f32 %v1259_v10, 0.0  ;;  %v2106_v12 = vpop.f32.mrb[24].mxu0 }
 0x1f2   : > { %v1274_v14 = vadd.f32 %v2106_v12, %v1816_v6  ;;  %v1268_v15 = vpop.f32.mrb[25].mxu0 }
 0x1f3   : > { %v1269_v16 = vadd.f32 %v1816_v6, %v1268_v15  ;;  %2141 = vmatprep.mubr.msk.f32.mxu1 %vm1143_vm1, %v1337_v11 }
 0x1f4   : > { %2142 = vmatmul.mubr.msk.f32.vlgmr.msra.gmra.mrb[26].mxu1 %vm1143_vm1, %v1338_v13  ;;  %v1340_v18 = vmax.f32 %v1274_v14, 0.0 }
 0x1f5   : > { %v1339_v45 = vmax.f32 %v1269_v16, 0.0  ;;  %v2109_v17 = vpop.f32.mrb[26].mxu0 }
 0x1f6   : > { %v1284_v19 = vadd.f32 %v2109_v17, %v1816_v6  ;;  %v1278_v20 = vpop.f32.mrb[27].mxu0 }
 0x1f7   : > { %v1279_v21 = vadd.f32 %v1816_v6, %v1278_v20  ;;  %2144 = vmatprep.mubr.msk.f32.mxu1 %vm1143_vm1, %v1339_v45 }
 0x1f8   : > { %2145 = vmatmul.mubr.msk.f32.gmra.mrb[28].mxu1 %vm1143_vm1, %v1340_v18  ;;  %v1342_v24 = vmax.f32 %v1284_v19, 0.0 }
 0x1f9   : > { %v1341_v22 = vmax.f32 %v1279_v21, 0.0  ;;  %v2112_v23 = vpop.f32.mrb[28].mxu0 }
 0x1fa   : > { %v1294_v25 = vadd.f32 %v2112_v23, %v1816_v6  ;;  %v1288_v26 = vpop.f32.mrb[29].mxu0 }
 0x1fb   : > { %v1289_v27 = vadd.f32 %v1816_v6, %v1288_v26  ;;  %2147 = vmatprep.mubr.msk.f32.mxu1 %vm1143_vm1, %v1341_v22 }
 0x1fc   : > { %2148 = vmatmul.mubr.msk.f32.gmra.mrb[30].mxu1 %vm1143_vm1, %v1342_v24  ;;  %v1344_v30 = vmax.f32 %v1294_v25, 0.0 }
 0x1fd   : > { %v1343_v28 = vmax.f32 %v1289_v27, 0.0  ;;  %v2115_v29 = vpop.f32.mrb[30].mxu0 }
 0x1fe   : > { %v1304_v31 = vadd.f32 %v2115_v29, %v1816_v6  ;;  %v1298_v32 = vpop.f32.mrb[31].mxu0 }
 0x1ff   : > { %v1299_v33 = vadd.f32 %v1816_v6, %v1298_v32  ;;  %2150 = vmatprep.mubr.msk.f32.mxu1 %vm1143_vm1, %v1343_v28 }
 0x200   : > { %2151 = vmatmul.mubr.msk.f32.gmra.mrb[32].mxu1 %vm1143_vm1, %v1344_v30  ;;  %v1346_v36 = vmax.f32 %v1304_v31, 0.0 }
 0x201   : > { %v1345_v34 = vmax.f32 %v1299_v33, 0.0  ;;  %v2118_v35 = vpop.f32.mrb[32].mxu0 }
 0x202   : > { %v1314_v37 = vadd.f32 %v2118_v35, %v1816_v6  ;;  %v1308_v38 = vpop.f32.mrb[33].mxu0 }
 0x203   : > { %v1309_v39 = vadd.f32 %v1816_v6, %v1308_v38  ;;  %2153 = vmatprep.mubr.msk.f32.mxu1 %vm1143_vm1, %v1345_v34 }
 0x204   : > { %2154 = vmatmul.mubr.msk.f32.gmra.mrb[34].mxu1 %vm1143_vm1, %v1346_v36  ;;  %v1348_v42 = vmax.f32 %v1314_v37, 0.0 }
 0x205   : > { %v1347_v40 = vmax.f32 %v1309_v39, 0.0  ;;  %v2121_v41 = vpop.f32.mrb[34].mxu0 }
 0x206   : > { %v1324_v43 = vadd.f32 %v2121_v41, %v1816_v6  ;;  %v1318_v44 = vpop.f32.mrb[35].mxu0 }
 0x207   : > { %v1319_v46 = vadd.f32 %v1816_v6, %v1318_v44  ;;  %2156 = vmatprep.mubr.msk.f32.mxu1 %vm1143_vm1, %v1347_v40 }
 0x208   : > { %2157 = vmatmul.mubr.msk.f32.gmra.mrb[36].mxu1 %vm1143_vm1, %v1348_v42  ;;  %v1350_v48 = vmax.f32 %v1324_v43, 0.0 }
 0x209   : > { %v1349_v47 = vmax.f32 %v1319_v46, 0.0  ;;  %v2124_v49 = vpop.f32.mrb[36].mxu0 }
 0x20a   : > { %v1334_v50 = vadd.f32 %v2124_v49, %v1816_v6  ;;  %v1328_v51 = vpop.f32.mrb[37].mxu0 }
 0x20b   : > { %2159 = vmatprep.mubr.msk.f32.mxu1 %vm1143_vm1, %v1349_v47  ;;  %v1329_v52 = vadd.f32 %v1816_v6, %v1328_v51 }
 0x20c   : > { %2160 = vmatmul.mubr.msk.f32.gmra.mrb[38].mxu1 %vm1143_vm1, %v1350_v48  ;;  %v1352_v54 = vmax.f32 %v1334_v50, 0.0 }
 0x20d   : > { %v1351_v53 = vmax.f32 %v1329_v52, 0.0 }
 0x20f   : > { %2162 = vmatprep.mubr.msk.f32.mxu1 %vm1143_vm1, %v1351_v53 }
 0x210   : > { %2163 = vmatmul.mubr.msk.f32.gmra.mrb[40].mxu1 %vm1143_vm1, %v1352_v54 }
 0x2c7   : > { %v2143_v56 = vpop.f32.mrb[26].mxu1 }
 0x2c8   : > { %v2758_v57 = vadd.f32 %v2143_v56, %v2755_v55  ;;  %v1482_v58 = vpop.f32.mrb[27].mxu1 }
 0x2c9   : > { %v2761_v59 = vadd.f32 %v2755_v55, %v1482_v58 }
 0x2ca   : > { %v1562_v60 = vmul.f32 %v2758_v57, %v2758_v57 }
 0x2cb   : > { %v2146_v61 = vpop.f32.mrb[28].mxu1  ;;  %v1561_v1 = vmul.f32 %v2761_v59, %v2761_v59 }
 0x2cc   : > { %v2766_v62 = vadd.f32 %v2146_v61, %v2755_v55  ;;  %v1492_v63 = vpop.f32.mrb[29].mxu1  ;;  %v1580_v0 = vsel %vm521_vm0, %v1562_v60, 0.0 }
 0x2cd   : > { %v2772_v2 = vadd.f32 %v2755_v55, %v1492_v63  ;;  %1581 = vadd.xlane.f32.xlu0 %v1580_v0  ;;  %v1577_v8 = vsel %vm521_vm0, %v1561_v1, 0.0 }
 0x2ce   : > { %v1564_v3 = vmul.f32 %v2766_v62, %v2766_v62 }
 0x2cf   : > { %v2149_v4 = vpop.f32.mrb[30].mxu1  ;;  %v1563_v9 = vmul.f32 %v2772_v2, %v2772_v2 }
 0x2d0   : > { %v2777_v5 = vadd.f32 %v2149_v4, %v2755_v55  ;;  %v1502_v6 = vpop.f32.mrb[31].mxu1  ;;  %v1586_v7 = vsel %vm521_vm0, %v1564_v3, 0.0 }
 0x2d1   : > { %v2784_v10 = vadd.f32 %v2755_v55, %v1502_v6  ;;  %1587 = vadd.xlane.f32.xlu1 %v1586_v7  ;;  %1578 = vadd.xlane.f32.xlu0 %v1577_v8  ;;  %v1583_v15 = vsel %vm521_vm0, %v1563_v9, 0.0 }
 0x2d2   : > { %v1566_v16 = vmul.f32 %v2777_v5, %v2777_v5 }
 0x2d3   : > { %v2152_v11 = vpop.f32.mrb[32].mxu1  ;;  %v1565_v12 = vmul.f32 %v2784_v10, %v2784_v10 }
 0x2d4   : > { %v2789_v13 = vadd.f32 %v2152_v11, %v2755_v55  ;;  %v1512_v14 = vpop.f32.mrb[33].mxu1  ;;  %v1592_v22 = vsel %vm521_vm0, %v1566_v16, 0.0 }
 0x2d5   : > { %v2795_v45 = vadd.f32 %v2755_v55, %v1512_v14  ;;  %1584 = vadd.xlane.f32.xlu1 %v1583_v15  ;;  %v1589_v17 = vsel %vm521_vm0, %v1565_v12, 0.0 }
 0x2d6   : > { %1590 = vadd.xlane.f32.xlu0 %v1589_v17  ;;  %v1568_v23 = vmul.f32 %v2789_v13, %v2789_v13 }
 0x2d7   : > { %v2155_v18 = vpop.f32.mrb[34].mxu1  ;;  %v1567_v19 = vmul.f32 %v2795_v45, %v2795_v45 }
 0x2d8   : > { %v2801_v20 = vadd.f32 %v2155_v18, %v2755_v55  ;;  %v1522_v21 = vpop.f32.mrb[35].mxu1  ;;  %v1598_v30 = vsel %vm521_vm0, %v1568_v23, 0.0 }
 0x2d9   : > { %v2807_v24 = vadd.f32 %v2755_v55, %v1522_v21  ;;  %1593 = vadd.xlane.f32.xlu1 %v1592_v22  ;;  %v1595_v25 = vsel %vm521_vm0, %v1567_v19, 0.0 }
 0x2da   : > { %1596 = vadd.xlane.f32.xlu0 %v1595_v25  ;;  %v1570_v31 = vmul.f32 %v2801_v20, %v2801_v20 }
 0x2db   : > { %v2158_v26 = vpop.f32.mrb[36].mxu1  ;;  %v1569_v27 = vmul.f32 %v2807_v24, %v2807_v24 }
 0x2dc   : > { %v2813_v28 = vadd.f32 %v2158_v26, %v2755_v55  ;;  %v1532_v29 = vpop.f32.mrb[37].mxu1  ;;  %v1604_v38 = vsel %vm521_vm0, %v1570_v31, 0.0 }
 0x2dd   : > { %v2819_v32 = vadd.f32 %v2755_v55, %v1532_v29  ;;  %1599 = vadd.xlane.f32.xlu1 %v1598_v30  ;;  %v1601_v33 = vsel %vm521_vm0, %v1569_v27, 0.0 }
 0x2de   : > { %1602 = vadd.xlane.f32.xlu0 %v1601_v33  ;;  %v1572_v39 = vmul.f32 %v2813_v28, %v2813_v28 }
 0x2df   : > { %v2161_v34 = vpop.f32.mrb[38].mxu1  ;;  %v1571_v35 = vmul.f32 %v2819_v32, %v2819_v32 }
 0x2e0   : > { %v2825_v36 = vadd.f32 %v2161_v34, %v2755_v55  ;;  %v1542_v37 = vpop.f32.mrb[39].mxu1  ;;  %v1610_v43 = vsel %vm521_vm0, %v1572_v39, 0.0 }
 0x2e1   : > { %v2831_v40 = vadd.f32 %v2755_v55, %v1542_v37  ;;  %1605 = vadd.xlane.f32.xlu1 %v1604_v38  ;;  %v1607_v41 = vsel %vm521_vm0, %v1571_v35, 0.0 }
 0x2e2   : > { %1608 = vadd.xlane.f32.xlu0 %v1607_v41  ;;  %v1574_v44 = vmul.f32 %v2825_v36, %v2825_v36 }
 0x2e3   : > { %v1573_v42 = vmul.f32 %v2831_v40, %v2831_v40  ;;  %v2164_v46 = vpop.f32.mrb[40].mxu1 }
 0x2e4   : > { %v2841_v48 = vadd.f32 %v2164_v46, %v2755_v55  ;;  %v1552_v49 = vpop.f32.mrb[41].mxu1  ;;  %v1616_v51 = vsel %vm521_vm0, %v1574_v44, 0.0 }
 0x2e5   : > { %1611 = vadd.xlane.f32.xlu1 %v1610_v43  ;;  %v1613_v47 = vsel %vm521_vm0, %v1573_v42, 0.0  ;;  %v2844_v50 = vadd.f32 %v2755_v55, %v1552_v49 }
 0x2e6   : > { %1614 = vadd.xlane.f32.xlu0 %v1613_v47  ;;  %v1576_v52 = vmul.f32 %v2841_v48, %v2841_v48 }
 0x2e7   : > { %v1575_v53 = vmul.f32 %v2844_v50, %v2844_v50 }
 0x2e8   : > { %v1622_v56 = vsel %vm521_vm0, %v1576_v52, 0.0 }
 0x2e9   : > { %1617 = vadd.xlane.f32.xlu1 %v1616_v51  ;;  %v1619_v54 = vsel %vm521_vm0, %v1575_v53, 0.0 }
 0x2ea   : > { %1620 = vadd.xlane.f32.xlu0 %v1619_v54 }
 0x2ed   : > { %1623 = vadd.xlane.f32.xlu1 %v1622_v56 }
 0x35a   : > { %v1582_v58 = vpop.xlane.xlu0 %1581 }
 0x35b   : > { %v1626_v60 = vmax.f32 %v1582_v58, 1e-16 }
 0x35d   : > { %2301 = vrsqrt.f32 %v1626_v60 }
 0x35e   : > { %v1588_v55 = vpop.xlane.xlu1 %1587  ;;  %v1579_v61 = vpop.xlane.xlu0 %1578 }
 0x35f   : > { %v1628_v63 = vmax.f32 %v1588_v55, 1e-16  ;;  %v1625_v0 = vmax.f32 %v1579_v61, 1e-16 }
 0x361   : > { %2303 = vrsqrt.f32 %v1628_v63 }
 0x362   : > { %2305 = vrsqrt.f32 %v1625_v0  ;;  %v1585_v1 = vpop.xlane.xlu1 %1584 }
 0x363   : > { %v1627_v3 = vmax.f32 %v1585_v1, 1e-16  ;;  %v1591_v4 = vpop.xlane.xlu0 %1590 }
 0x364   : > { %v1629_v6 = vmax.f32 %v1591_v4, 1e-16 }
 0x365   : > { %2307 = vrsqrt.f32 %v1627_v3 }
 0x366   : > { %2309 = vrsqrt.f32 %v1629_v6  ;;  %v1594_v7 = vpop.xlane.xlu1 %1593 }
 0x367   : > { %v2302_v8 = vpop.eup %2301  ;;  %v1630_v9 = vmax.f32 %v1594_v7, 1e-16  ;;  %v1597_v11 = vpop.xlane.xlu0 %1596 }
 0x368   : > { %v1658_v12 = vmul.f32 %v2302_v8, %v2758_v57  ;;  %v1631_v14 = vmax.f32 %v1597_v11, 1e-16 }
 0x369   : > { %2311 = vrsqrt.f32 %v1630_v9 }
 0x36a   : > { %1674 = vst.msk [vmem:[%s2857_s19 + $0x8] sm:$0xff] %vm521_vm0, %v1658_v12  ;;  %2313 = vrsqrt.f32 %v1631_v14  ;;  %v1600_v15 = vpop.xlane.xlu1 %1599 }
 0x36b   : > { %v2304_v16 = vpop.eup %2303  ;;  %v1632_v17 = vmax.f32 %v1600_v15, 1e-16  ;;  %v1603_v18 = vpop.xlane.xlu0 %1602 }
 0x36c   : > { %v2306_v19 = vpop.eup %2305  ;;  %v1660_v21 = vmul.f32 %v2304_v16, %v2766_v62  ;;  %v1633_v22 = vmax.f32 %v1603_v18, 1e-16 }
 0x36d   : > { %v1657_v23 = vmul.f32 %v2306_v19, %v2761_v59  ;;  %2315 = vrsqrt.f32 %v1632_v17 }
 0x36e   : > { %1676 = vst.msk [vmem:[%s2857_s19 + $0x18] sm:$0xff] %vm521_vm0, %v1660_v21  ;;  %2317 = vrsqrt.f32 %v1633_v22  ;;  %v1606_v57 = vpop.xlane.xlu1 %1605 }
 0x36f   : > { %v2308_v25 = vpop.eup %2307  ;;  %1673 = vst.msk [vmem:[%s2857_s19] sm:$0xff] %vm521_vm0, %v1657_v23  ;;  %v1634_v26 = vmax.f32 %v1606_v57, 1e-16  ;;  %v1609_v27 = vpop.xlane.xlu0 %1608 }
 0x370   : > { %v2310_v29 = vpop.eup %2309  ;;  %v1659_v30 = vmul.f32 %v2308_v25, %v2772_v2  ;;  %v1635_v62 = vmax.f32 %v1609_v27, 1e-16 }
 0x371   : > { %v1661_v31 = vmul.f32 %v2310_v29, %v2784_v10  ;;  %2319 = vrsqrt.f32 %v1634_v26 }
 0x372   : > { %1675 = vst.msk [vmem:[%s2857_s19 + $0x10] sm:$0xff] %vm521_vm0, %v1659_v30  ;;  %2321 = vrsqrt.f32 %v1635_v62  ;;  %v1612_v59 = vpop.xlane.xlu1 %1611 }
 0x373   : > { %v2312_v33 = vpop.eup %2311  ;;  %1677 = vst.msk [vmem:[%s2857_s19 + $0x20] sm:$0xff] %vm521_vm0, %v1661_v31  ;;  %v1636_v34 = vmax.f32 %v1612_v59, 1e-16  ;;  %v1615_v35 = vpop.xlane.xlu0 %1614 }
 0x374   : > { %v2314_v37 = vpop.eup %2313  ;;  %v1662_v38 = vmul.f32 %v2312_v33, %v2777_v5  ;;  %v1637_v2 = vmax.f32 %v1615_v35, 1e-16 }
 0x375   : > { %v1663_v39 = vmul.f32 %v2314_v37, %v2795_v45  ;;  %2323 = vrsqrt.f32 %v1636_v34 }
 0x376   : > { %1678 = vst.msk [vmem:[%s2857_s19 + $0x28] sm:$0xff] %vm521_vm0, %v1662_v38  ;;  %2325 = vrsqrt.f32 %v1637_v2  ;;  %v1618_v10 = vpop.xlane.xlu1 %1617 }
 0x377   : > { %v2316_v41 = vpop.eup %2315  ;;  %1679 = vst.msk [vmem:[%s2857_s19 + $0x30] sm:$0xff] %vm521_vm0, %v1663_v39  ;;  %v1638_v42 = vmax.f32 %v1618_v10, 1e-16  ;;  %v1621_v5 = vpop.xlane.xlu0 %1620 }
 0x378   : > { %v2318_v43 = vpop.eup %2317  ;;  %v1664_v44 = vmul.f32 %v2316_v41, %v2789_v13  ;;  %v1639_v45 = vmax.f32 %v1621_v5, 1e-16 }
 0x379   : > { %v1665_v46 = vmul.f32 %v2318_v43, %v2807_v24  ;;  %2327 = vrsqrt.f32 %v1638_v42 }
 0x37a   : > { %1680 = vst.msk [vmem:[%s2857_s19 + $0x38] sm:$0xff] %vm521_vm0, %v1664_v44  ;;  %v1624_v47 = vpop.xlane.xlu1 %1623  ;;  %2329 = vrsqrt.f32 %v1639_v45 }
 0x37b   : > { %v2320_v49 = vpop.eup %2319  ;;  %1681 = vst.msk [vmem:[%s2857_s19 + $0x40] sm:$0xff] %vm521_vm0, %v1665_v46  ;;  %v1640_v51 = vmax.f32 %v1624_v47, 1e-16 }
 0x37c   : > { %v2322_v52 = vpop.eup %2321  ;;  %v1666_v53 = vmul.f32 %v2320_v49, %v2801_v20 }
 0x37d   : > { %v1667_v13 = vmul.f32 %v2322_v52, %v2819_v32  ;;  %2331 = vrsqrt.f32 %v1640_v51 }
 0x37e   : > { %1682 = vst.msk [vmem:[%s2857_s19 + $0x48] sm:$0xff] %vm521_vm0, %v1666_v53 }
 0x37f   : > { %v2324_v24 = vpop.eup %2323  ;;  %1683 = vst.msk [vmem:[%s2857_s19 + $0x50] sm:$0xff] %vm521_vm0, %v1667_v13 }
 0x380   : > { %v2326_v54 = vpop.eup %2325  ;;  %v1668_v56 = vmul.f32 %v2324_v24, %v2813_v28 }
 0x381   : > { %v1669_v58 = vmul.f32 %v2326_v54, %v2831_v40 }
 0x382   : > { %1684 = vst.msk [vmem:[%s2857_s19 + $0x58] sm:$0xff] %vm521_vm0, %v1668_v56 }
 0x383   : > { %v2328_v60 = vpop.eup %2327  ;;  %1685 = vst.msk [vmem:[%s2857_s19 + $0x60] sm:$0xff] %vm521_vm0, %v1669_v58 }
 0x384   : > { %v1670_v20 = vmul.f32 %v2328_v60, %v2825_v36  ;;  %v2330_v32 = vpop.eup %2329 }
 0x385   : > { %v1671_v61 = vmul.f32 %v2330_v32, %v2844_v50 }
 0x386   : > { %1686 = vst.msk [vmem:[%s2857_s19 + $0x68] sm:$0xff] %vm521_vm0, %v1670_v20 }
 0x387   : > { %v2332_v55 = vpop.eup %2331  ;;  %1687 = vst.msk [vmem:[%s2857_s19 + $0x70] sm:$0xff] %vm521_vm0, %v1671_v61 }
 0x388   : > { %v1672_v63 = vmul.f32 %v2332_v55, %v2841_v48 }
 0x38a   : > { %1688 = vst.msk [vmem:[%s2857_s19 + $0x78] sm:$0xff] %vm521_vm0, %v1672_v63 }
 0x38b PF: > { %s21_s17 = sadd.s32 1, %s2339_s17  }
 0x38c   : > { %p18_p4 = scmp.ge.s32.totalorder %s21_s17, 6  }
 0x38e   :  { %20 = sbr.rel (!%p18_p4) target bundleno = 1 (0x1), region = 100 }

</bundles_post_ra>
